<compile_context>
chip_gen: v6e
topology: v6e:2x2x1
jax: 0.10.0
libtpu: 0.0.40
codegen_flags: <defaults>
</compile_context>

<pallas_src>
import functools

import jax
import jax.numpy as jnp
from jax import lax
from jax.experimental import pallas as pl
from jax.experimental.pallas import tpu as pltpu


# ----------------------------------------------------------------- helpers --
def _round_down(x, m):
    return (x // m) * m


def _device_kind():
    try:
        return jax.devices()[0].device_kind.lower()
    except Exception:
        return ""


def _default_budgets():
    """Per-generation (target_tile_bytes, vmem_limit_bytes)."""
    kind = _device_kind()
    if "v6" in kind or "trillium" in kind:
        # 128 MiB physical VMEM: bigger tiles amortize the ~0.35us/step
        # overhead; raise the scoped limit so in+out double buffers fit.
        return 8 << 20, 64 << 20
    if "v5" in kind:
        # Default scoped VMEM is only 16 MiB; keep 4 MiB tiles but raise the
        # limit explicitly so double buffering is not silently dropped.
        return 4 << 20, 64 << 20
    # v7x / unknown: 64 MiB physical VMEM shared by two TensorCores.
    return 4 << 20, 40 << 20


def _compute_dtype(x_dtype):
    # bf16 VALU exists on v6e/v7x; v5e must upcast to f32.
    if x_dtype == jnp.bfloat16 and "v5" not in _device_kind():
        return jnp.bfloat16
    return jnp.float32


def _pick_tiles(rows, cols, itemsize, target_bytes):
    """(row_tile, col_tile) obeying the (8, 128) rule and a VMEM budget."""
    if cols <= 128:
        col_tile = cols
    else:
        budget_cols = max(128, _round_down(target_bytes // (8 * itemsize), 128))
        if cols % 128 != 0 and cols * 8 * itemsize <= 2 * target_bytes:
            # Full-extent last dim is legal even when not 128-aligned; it keeps
            # every output store lane-dense and avoids a degenerate tail column.
            col_tile = cols
        else:
            col_tile = min(_round_down(cols, 128), budget_cols)
    if rows <= 8:
        row_tile = rows
    else:
        budget_rows = max(8, _round_down(target_bytes // (col_tile * itemsize), 8))
        row_tile = max(8, min(_round_down(rows, 8), budget_rows))
    return row_tile, col_tile


# -------------------------------------------------- ApplyStyle (modulation) --
def _modulate_kernel(scale_ref, shift_ref, x_ref, o_ref, *, compute_dtype):
    # scale/shift: (row_t, 1) f32 ; x/o: (row_t, col_t)
    x = x_ref[...].astype(compute_dtype)
    a = scale_ref[...].astype(compute_dtype)
    b = shift_ref[...].astype(compute_dtype)
    o_ref[...] = (x * a + b).astype(o_ref.dtype)


def apply_style(x, latent, weight, bias, *, target_tile_bytes=None,
                vmem_limit_bytes=None, donate_x=False):
    """ApplyStyle.forward: x * (style_scale + 1) + style_shift.

    x: [B, C, H, W]; latent: [B, L]; weight: [2C, L]; bias: [2C].
    """
    B, C, H, W = x.shape
    HW = H * W
    rows = B * C
    t_def, v_def = _default_budgets()
    target_tile_bytes = target_tile_bytes or t_def
    vmem_limit_bytes = vmem_limit_bytes or v_def

    # Style Linear hoisted out of the kernel; fold +1.0 into the scale half.
    style = (latent.astype(jnp.float32) @ weight.astype(jnp.float32).T
             + bias.astype(jnp.float32))                     # (B, 2C)
    scale = (style[:, :C] + 1.0).reshape(rows, 1)            # (B*C, 1)
    shift = style[:, C:].reshape(rows, 1)                    # (B*C, 1)

    x2d = x.reshape(rows, HW)
    row_t, col_t = _pick_tiles(rows, HW, x2d.dtype.itemsize, target_tile_bytes)
    grid = (pl.cdiv(rows, row_t), pl.cdiv(HW, col_t))
    kernel = functools.partial(_modulate_kernel,
                               compute_dtype=_compute_dtype(x.dtype))

    out = pl.pallas_call(
        kernel,
        out_shape=jax.ShapeDtypeStruct((rows, HW), x.dtype),
        grid_spec=pltpu.PrefetchScalarGridSpec(
            num_scalar_prefetch=0,
            grid=grid,
            in_specs=[
                pl.BlockSpec((row_t, 1), lambda r, t: (r, 0)),      # scale
                pl.BlockSpec((row_t, 1), lambda r, t: (r, 0)),      # shift
                pl.BlockSpec((row_t, col_t), lambda r, t: (r, t)),  # x tile
            ],
            out_specs=pl.BlockSpec((row_t, col_t), lambda r, t: (r, t)),
        ),
        compiler_params=pltpu.CompilerParams(
            dimension_semantics=("parallel", "parallel"),
            vmem_limit_bytes=vmem_limit_bytes),
        input_output_aliases=({2: 0} if donate_x else {}),
    )(scale, shift, x2d)
    return out.reshape(B, C, H, W)


# --------------------------- fused InstanceNorm + ApplyStyle (+ReLU/+res) ----
def _adain_kernel(scale_ref, shift_ref, x_ref, *rest, eps, relu, has_residual):
    # scale/shift: (1, c_t, 1) f32 ; x / residual / o: (1, c_t, HW)
    if has_residual:
        res_ref, o_ref = rest
    else:
        (o_ref,) = rest
    x = x_ref[...].astype(jnp.float32)
    mean = jnp.mean(x, axis=-1, keepdims=True)
    xc = x - mean
    var = jnp.mean(xc * xc, axis=-1, keepdims=True)
    inv = lax.rsqrt(var + eps)
    y = xc * inv * scale_ref[...] + shift_ref[...]
    if relu:
        y = jnp.maximum(y, 0.0)
    if has_residual:
        y = y + res_ref[...].astype(jnp.float32)
    o_ref[...] = y.astype(o_ref.dtype)


def adain_apply_style(x, latent, weight, bias, *, eps=1e-8, relu=False,
                      residual=None, target_tile_bytes=None,
                      vmem_limit_bytes=None, donate_x=False, min_programs=8):
    """Fused InstanceNorm + ApplyStyle [+ ReLU] [+ residual add].

    This is the elementwise tail of ResnetBlock_Adain:
      relu=True, residual=None  -> act1(style1(InstanceNorm(conv1_out)))
      relu=False, residual=x_in -> x_in + style2(InstanceNorm(conv2_out))
    """
    B, C, H, W = x.shape
    HW = H * W
    t_def, v_def = _default_budgets()
    target_tile_bytes = target_tile_bytes or t_def
    vmem_limit_bytes = vmem_limit_bytes or v_def

    style = (latent.astype(jnp.float32) @ weight.astype(jnp.float32).T
             + bias.astype(jnp.float32))                     # (B, 2C)
    scale = (style[:, :C] + 1.0).reshape(B, C, 1)
    shift = style[:, C:].reshape(B, C, 1)

    x3 = x.reshape(B, C, HW)
    itemsize = x3.dtype.itemsize
    # Channel tile: multiple of 8 (or full C). H*W stays whole per block so the
    # per-(b, c) mean/var is computed in one pass.
    if C <= 8:
        c_tile = C
    else:
        budget_c = max(8, _round_down(target_tile_bytes // (HW * itemsize), 8))
        c_tile = max(8, min(_round_down(C, 8), budget_c))
        # Keep >= min_programs grid steps so double buffering has work to
        # overlap and both v7x TensorCores get programs (B=1, C=512 would
        # otherwise be a 1x1 grid with zero pipelining).
        want_c_tiles = pl.cdiv(min_programs, B)
        if want_c_tiles > 1:
            cap = max(8, _round_down(pl.cdiv(C, want_c_tiles), 8))
            c_tile = min(c_tile, cap)
    grid = (B, pl.cdiv(C, c_tile))

    has_residual = residual is not None
    kernel = functools.partial(_adain_kernel, eps=eps, relu=relu,
                               has_residual=has_residual)
    x_spec = pl.BlockSpec((1, c_tile, HW), lambda b, c: (b, c, 0))
    ss_spec = pl.BlockSpec((1, c_tile, 1), lambda b, c: (b, c, 0))
    in_specs = [ss_spec, ss_spec, x_spec]
    operands = [scale, shift, x3]
    if has_residual:
        in_specs.append(x_spec)
        operands.append(residual.reshape(B, C, HW))

    out = pl.pallas_call(
        kernel,
        out_shape=jax.ShapeDtypeStruct((B, C, HW), x.dtype),
        grid_spec=pltpu.PrefetchScalarGridSpec(
            num_scalar_prefetch=0,
            grid=grid,
            in_specs=in_specs,
            out_specs=x_spec,
        ),
        compiler_params=pltpu.CompilerParams(
            dimension_semantics=("parallel", "parallel"),
            vmem_limit_bytes=vmem_limit_bytes),
        input_output_aliases=({2: 0} if donate_x else {}),
    )(*operands)
    return out.reshape(B, C, H, W)


# ----------------------------------------------------------- references -----
def apply_style_ref(x, latent, weight, bias):
    B, C, H, W = x.shape
    style = latent @ weight.T + bias                 # (B, 2C)
    style = style.reshape(B, 2, C, 1, 1)
    return x * (style[:, 0] + 1.0) + style[:, 1]


def adain_apply_style_ref(x, latent, weight, bias, eps=1e-8, relu=False,
                          residual=None):
    mean = jnp.mean(x, axis=(2, 3), keepdims=True)
    xc = x - mean
    inv = lax.rsqrt(jnp.mean(xc * xc, axis=(2, 3), keepdims=True) + eps)
    y = apply_style_ref(xc * inv, latent, weight, bias)
    if relu:
        y = jnp.maximum(y, 0.0)
    if residual is not None:
        y = y + residual
    return y


# TODO(synk): Conv2d (reflection-padded), bilinear Upsample, BatchNorm and Tanh
# stages of the full generator are left to XLA; only the AdaIN style-modulation
# path (InstanceNorm + ApplyStyle + ReLU/residual) is implemented in Pallas.

if __name__ == "__main__":
    def make_inputs(key, B, C, H, W, L, dtype=jnp.float32):
        kx, kl, kw, kb = jax.random.split(key, 4)
        x = jax.random.normal(kx, (B, C, H, W), dtype=jnp.float32).astype(dtype)
        latent = jax.random.normal(kl, (B, L), dtype=jnp.float32)
        bound = 1.0 / (L ** 0.5)
        weight = jax.random.uniform(kw, (2 * C, L), jnp.float32, -bound, bound)
        bias = jax.random.uniform(kb, (2 * C,), jnp.float32, -bound, bound)
        return x, latent, weight, bias

    # Case 1: small demo shape consistent with the module.
    x, latent, weight, bias = make_inputs(jax.random.PRNGKey(0), 2, 4, 16, 16, 8)

    out = jax.block_until_ready(apply_style(x, latent, weight, bias))
    ref = apply_style_ref(x, latent, weight, bias)
    assert out.shape == x.shape
    assert jnp.allclose(out, ref, atol=1e-5, rtol=1e-5), "ApplyStyle mismatch"

    out_f = jax.block_until_ready(adain_apply_style(x, latent, weight, bias))
    ref_f = adain_apply_style_ref(x, latent, weight, bias)
    assert jnp.allclose(out_f, ref_f, atol=1e-4, rtol=1e-4), "AdaIN mismatch"

    # Case 2: multi-tile grids on both axes (tiny VMEM budget) plus the fused
    # ReLU + residual epilogue used inside ResnetBlock_Adain.
    x2, latent2, weight2, bias2 = make_inputs(jax.random.PRNGKey(1), 2, 16, 32, 64, 8)
    res2 = jax.random.normal(jax.random.PRNGKey(2), x2.shape, dtype=jnp.float32)

    out2 = jax.block_until_ready(
        apply_style(x2, latent2, weight2, bias2, target_tile_bytes=32 << 10))
    ref2 = apply_style_ref(x2, latent2, weight2, bias2)
    assert jnp.allclose(out2, ref2, atol=1e-5, rtol=1e-5), "tiled ApplyStyle mismatch"

    out2f = jax.block_until_ready(
        adain_apply_style(x2, latent2, weight2, bias2, relu=True, residual=res2,
                          target_tile_bytes=32 << 10))
    ref2f = adain_apply_style_ref(x2, latent2, weight2, bias2,
                                  relu=True, residual=res2)
    assert jnp.allclose(out2f, ref2f, atol=1e-4, rtol=1e-4), "fused AdaIN mismatch"

    # Case 3: non-multiple-of-128 spatial extent (the 28x28 bottleneck shape):
    # the full-extent lane axis keeps every store lane-dense (no tail column).
    x3, latent3, weight3, bias3 = make_inputs(jax.random.PRNGKey(3), 1, 16, 28, 28, 8)
    out3 = jax.block_until_ready(apply_style(x3, latent3, weight3, bias3))
    ref3 = apply_style_ref(x3, latent3, weight3, bias3)
    assert jnp.allclose(out3, ref3, atol=1e-5, rtol=1e-5), "784-lane ApplyStyle mismatch"

    # Case 4: bf16 activations take the native bf16 VALU path on v6e/v7x
    # (f32 upcast is kept automatically on v5e).
    xb, latentb, weightb, biasb = make_inputs(jax.random.PRNGKey(4), 2, 8, 16, 16, 8,
                                              dtype=jnp.bfloat16)
    outb = jax.block_until_ready(apply_style(xb, latentb, weightb, biasb))
    refb = apply_style_ref(xb.astype(jnp.float32), latentb, weightb, biasb)
    assert jnp.allclose(outb.astype(jnp.float32), refb, atol=5e-2, rtol=5e-2), \
        "bf16 ApplyStyle mismatch"

    print("KERNEL_OK")
</pallas_src>

<mosaic_0001>
module attributes {stable_mosaic.version = 11 : i64} {
  func.func @_modulate_kernel(%arg0: i32, %arg1: i32, %arg2: memref<8x1xf32, #tpu.memory_space<vmem>>, %arg3: memref<8x1xf32, #tpu.memory_space<vmem>>, %arg4: memref<8x256xf32, #tpu.memory_space<vmem>>, %arg5: memref<8x256xf32, #tpu.memory_space<vmem>>) attributes {dimension_semantics = [#tpu.dimension_semantics<parallel>, #tpu.dimension_semantics<parallel>], iteration_bounds = array<i64: 1, 1>, scalar_prefetch = 0 : i64, scratch_operands = 0 : i64, tpu.core_type = #tpu.core_type<tc>, window_params = [{transform_indices = @transform_0, window_bounds = array<i64: 8, 1>}, {transform_indices = @transform_1, window_bounds = array<i64: 8, 1>}, {transform_indices = @transform_2, window_bounds = array<i64: 8, 256>}, {transform_indices = @transform_3, window_bounds = array<i64: 8, 256>}]} {
    %c0 = arith.constant 0 : index
    %c0_0 = arith.constant 0 : index
    %0 = vector.load %arg4[%c0, %c0_0] : memref<8x256xf32, #tpu.memory_space<vmem>>, vector<8x256xf32>
    %c0_1 = arith.constant 0 : index
    %c0_2 = arith.constant 0 : index
    %1 = vector.load %arg2[%c0_1, %c0_2] : memref<8x1xf32, #tpu.memory_space<vmem>>, vector<8x1xf32>
    %c0_3 = arith.constant 0 : index
    %c0_4 = arith.constant 0 : index
    %2 = vector.load %arg3[%c0_3, %c0_4] : memref<8x1xf32, #tpu.memory_space<vmem>>, vector<8x1xf32>
    %3 = vector.broadcast %1 : vector<8x1xf32> to vector<8x256xf32>
    %4 = arith.mulf %0, %3 : vector<8x256xf32>
    %5 = vector.broadcast %2 : vector<8x1xf32> to vector<8x256xf32>
    %6 = arith.addf %4, %5 : vector<8x256xf32>
    %c0_5 = arith.constant 0 : index
    %c0_6 = arith.constant 0 : index
    %7 = vector.load %arg5[%c0_5, %c0_6] : memref<8x256xf32, #tpu.memory_space<vmem>>, vector<8x256xf32>
    tpu.vector_store %arg5[%c0_5, %c0_6], %6 {strides = array<i32>} : memref<8x256xf32, #tpu.memory_space<vmem>>, vector<8x256xf32>,
    return
  }
  func.func @transform_0(%arg0: i32, %arg1: i32) -> (i32, i32) {
    %c0_i32 = arith.constant 0 : i32
    %c0_i32_0 = arith.constant 0 : i32
    return %arg0, %c0_i32 : i32, i32
  }
  func.func @transform_1(%arg0: i32, %arg1: i32) -> (i32, i32) {
    %c0_i32 = arith.constant 0 : i32
    %c0_i32_0 = arith.constant 0 : i32
    return %arg0, %c0_i32 : i32, i32
  }
  func.func @transform_2(%arg0: i32, %arg1: i32) -> (i32, i32) {
    %c0_i32 = arith.constant 0 : i32
    return %arg0, %arg1 : i32, i32
  }
  func.func @transform_3(%arg0: i32, %arg1: i32) -> (i32, i32) {
    %c0_i32 = arith.constant 0 : i32
    return %arg0, %arg1 : i32, i32
  }
}

</mosaic_0001>

<bundles_post_ra>
// kernel: tpu_custom_call.1
= control target key start
LH: loop header
LB: loop body
LE: loop exit
PB: predicated region body
PF: predicated region fallthrough
CT: control target
= control target key end

     0   :  { %v74_v1 = vmov 0   ;;  %s111_s0 = inlined_call_operand.vmem [shape: f32[8,1], index: 0, kind: input, shape index: {}]   ;;  %s112_s1 = inlined_call_operand.vmem [shape: f32[8,1], index: 1, kind: input, shape index: {}]   ;;  %s113_s2 = inlined_call_operand.vmem [shape: f32[8,256], index: 2, kind: input, shape index: {}]   ;;  %s114_s3 = inlined_call_operand.hbm [shape: f32[8,256], index: 3, kind: output, shape index: {}]  }
   0x1   :  { %v17_v0 = vld [vmem:[%s111_s0] sm:$0xff]  ;;  %51 = vset.pattern.permute.xlu0 %v74_v1 }
   0x2   :  { %8 = vsyncpa [#allocation3], 0  ;;  %21 = vperm.xlu0 %51, %v17_v0   ;;  %v18_v2 = vld [vmem:[%s112_s1] sm:$0xff]  ;;  %v16_v5 = vld [vmem:[%s113_s2 + $0x8] sm:$0xff]  ;;  %s75_s20 = smov [#allocation2]  }
   0x3   :  { %v15_v4 = vld [vmem:[%s113_s2] sm:$0xff]  ;;  %s41_s0 = sshll.u32 %s75_s20, 4  ;;  %s42_s0 = int_to_ptr.vmem [resolvable:$true] %s41_s0 }
   0x4   :  { %s52_s1 = scalar_lea.vmem %s42_s0, 256  ;;  %p57_p1 = scmp.lt.s32.totalorder %s42_s0, %s42_s0 }
   0x5   :  { %p53_p0 = scmp.ne.s32.totalorder %s42_s0, %s52_s1  ;;  %p58_p2 = scmp.lt.s32.totalorder %s52_s1, %s52_s1 }
   0x6   :  { %28 = vperm.xlu0 %51, %v18_v2  }
   0x7   :  { %p59_p3 = por %p58_p2, %p57_p1 }
   0x9   :  { %p60_p4 = pnand %p59_p3, %p53_p0 }
  0x7d   :  { %v22_v3 = vpop.permute.xlu0 %21 }
  0x7e   :  { %v24_v6 = vmul.f32 %v22_v3, %v15_v4  ;;  %v25_v7 = vmul.f32 %v22_v3, %v16_v5 }
  0x81   :  { %v29_v8 = vpop.permute.xlu0 %28 }
  0x82   :  { %v31_v9 = vadd.f32 %v29_v8, %v24_v6  ;;  %v32_v10 = vadd.f32 %v29_v8, %v25_v7 }
  0x84   :  { %33 = vst [vmem:[#allocation2] sm:$0xff] %v31_v9  ;;  %34 = vst [vmem:[#allocation2 + $0x8] sm:$0xff] %v32_v10 }
  0x85   :  { %63 = shalt.err (!%p60_p4)
}
  0x86   :  { %44 = dma.vmem_to_hbm [thread:$0]  %s42_s0, 256, %s114_s3, [#allocation3]  }
  0x87   :  { %72 = dma.done.wait [#allocation3], 256  }
  0x88   :  { %73 = vsyncadd [#allocation3], 4294967040 }
  0x89   :  { %48 = vsyncpa [#allocation3], 1 }

</bundles_post_ra>
